<compile_context>
chip_gen: v5e
topology: v5e:2x2
jax: 0.10.0
libtpu: 0.0.40
codegen_flags: <defaults>
</compile_context>

<pallas_src>
import functools

import jax
import jax.numpy as jnp
from jax import lax
from jax.experimental import pallas as pl
from jax.experimental.pallas import tpu as pltpu


def _round_up(n, m):
    return ((n + m - 1) // m) * m


def mlp_kernel(x_ref, w1_ref, b1_ref, w2_ref, b2_ref, o_ref, *, chunk):
    # x_ref : (tile_b, state_dim)   streamed per grid step (may be a partial block)
    # w1_ref: (hidden_p, state_dim) resident (PyTorch fc1.weight layout, zero-padded)
    # b1_ref: (hidden_p, 1) f32     resident
    # w2_ref: (hidden_p, 1) f32     resident (fc2.weight as a column, zero-padded)
    # b2_ref: (1,) f32 scalar in SMEM
    # o_ref : (1, tile_b)           lane-dense output row
    w1 = w1_ref[...]
    b1 = b1_ref[...]
    w2 = w2_ref[...]
    b2 = b2_ref[0]

    n_chunks = x_ref.shape[0] // chunk  # static
    # Statically-unrolled chunk loop: bounds the (hidden_p, chunk) f32
    # intermediate to ~32 vregs while keeping every slice static.
    for j in range(n_chunks):
        r0 = j * chunk
        x = x_ref[r0:r0 + chunk, :]
        if x.dtype != w1.dtype:
            x = x.astype(w1.dtype)  # optional bf16-MXU path: cast in-register, no HBM pass
        # fc1 on the MXU, contracting state_dim, output already transposed:
        #   h[h, b] = sum_s W1[h, s] * x[b, s]
        h = lax.dot_general(w1, x, (((1,), (1,)), ((), ())),
                            preferred_element_type=jnp.float32)     # (hidden_p, chunk)
        h = jnp.maximum(h + b1, 0.0)                                 # bias + ReLU (f32 VPU)
        # fc2: VPU multiply by the w2 column + sublane (XLU) reduce -> (1, chunk)
        o = jnp.sum(h * w2, axis=0, keepdims=True) + b2
        o_ref[:, r0:r0 + chunk] = o.astype(o_ref.dtype)


def prepare_mlp_rotation_value_params(w1, b1, w2, b2, *, mxu_dtype=jnp.float32):
    """One-time weight prep (hoist out of the per-step hot path).

    w1: (hidden, state_dim)  PyTorch fc1.weight layout
    b1: (hidden,)            fc1.bias
    w2: (1, hidden)          fc2.weight
    b2: (1,)                 fc2.bias
    """
    hidden, _ = w1.shape
    hidden_p = _round_up(hidden, 128)
    pad_h = hidden_p - hidden
    w1_p = jnp.pad(w1, ((0, pad_h), (0, 0))).astype(mxu_dtype)
    b1_p = jnp.pad(b1, (0, pad_h)).reshape(hidden_p, 1).astype(jnp.float32)
    w2_p = jnp.pad(w2.reshape(hidden), (0, pad_h)).reshape(hidden_p, 1).astype(jnp.float32)
    b2_s = b2.reshape(1).astype(jnp.float32)
    return (w1_p, b1_p, w2_p, b2_s)


def mlp_rotation_value_prepared(x, params, *, tile_b=4096, chunk=256,
                                split_for_megacore=True):
    """Forward pass with pre-padded/cast params.  x: (B, state_dim). -> (B, 1)."""
    w1_p, b1_p, w2_p, b2_s = params
    B, state_dim = x.shape
    hidden_p = w1_p.shape[0]

    # --- tile selection (no padding of x; Pallas handles partial blocks) ------
    chunk = _round_up(min(chunk, _round_up(B, 128)), 128)
    tile_b = _round_up(tile_b, chunk)
    tile = min(tile_b, _round_up(B, chunk))
    nb = pl.cdiv(B, tile)
    if split_for_megacore and nb == 1 and B > 2 * chunk:
        # Keep both v7x TensorCores busy (harmless on single-TC v5e/v6e).
        tile = _round_up(-(-B // 2), chunk)
        nb = pl.cdiv(B, tile)

    # --- VMEM budget: lane-padded, double-buffered x block + output row ------
    lane = 128
    x_block = tile * _round_up(state_dim, lane) * x.dtype.itemsize
    o_block = 8 * tile * 4
    w_block = (hidden_p * _round_up(state_dim, lane) * jnp.dtype(w1_p.dtype).itemsize
               + 2 * hidden_p * lane * 4)
    vmem_bytes = int(min(max(2 * (x_block + o_block) + 2 * w_block + (2 << 20),
                             16 << 20), 48 << 20))

    kernel = functools.partial(mlp_kernel, chunk=chunk)
    out_row = pl.pallas_call(
        kernel,
        out_shape=jax.ShapeDtypeStruct((1, nb * tile), jnp.float32),
        grid_spec=pltpu.PrefetchScalarGridSpec(
            num_scalar_prefetch=0,
            grid=(nb,),
            in_specs=[
                pl.BlockSpec((tile, state_dim), lambda i: (i, 0)),      # x (streamed)
                pl.BlockSpec((hidden_p, state_dim), lambda i: (0, 0)),  # W1 (resident)
                pl.BlockSpec((hidden_p, 1), lambda i: (0, 0)),          # b1 column
                pl.BlockSpec((hidden_p, 1), lambda i: (0, 0)),          # w2 column
                pl.BlockSpec(memory_space=pltpu.MemorySpace.SMEM),      # b2 scalar
            ],
            out_specs=pl.BlockSpec((1, tile), lambda i: (0, i)),        # lane-dense row
        ),
        compiler_params=pltpu.CompilerParams(
            dimension_semantics=("parallel",),
            vmem_limit_bytes=vmem_bytes),
    )(x, w1_p, b1_p, w2_p, b2_s)

    # Restore the (B, 1) column expected by the PyTorch module (columns >= B of
    # the last partial block are garbage and dropped here).
    return out_row[0, :B].reshape(B, 1).astype(x.dtype)


def mlp_rotation_value(x, w1, b1, w2, b2, **kwargs):
    """Convenience wrapper; for hot loops call prepare_... once instead."""
    return mlp_rotation_value_prepared(
        x, prepare_mlp_rotation_value_params(w1, b1, w2, b2), **kwargs)


def init_params(key, state_dim, hidden=100, out_dim=1):
    """Deterministic init matching the PyTorch module's init scheme."""
    k1, k2, k3, k4 = jax.random.split(key, 4)
    std1 = (2.0 / state_dim) ** 0.5                      # kaiming_normal_
    w1 = jax.random.normal(k1, (hidden, state_dim), jnp.float32) * std1
    bound1 = 1.0 / (state_dim ** 0.5)                    # Linear default bias init
    b1 = jax.random.uniform(k2, (hidden,), jnp.float32, -bound1, bound1)
    std2 = (2.0 / (hidden + out_dim)) ** 0.5             # xavier_normal_
    w2 = jax.random.normal(k3, (out_dim, hidden), jnp.float32) * std2
    bound2 = 1.0 / (hidden ** 0.5)
    b2 = jax.random.uniform(k4, (out_dim,), jnp.float32, -bound2, bound2)
    return w1, b1, w2, b2


if __name__ == "__main__":
    key = jax.random.PRNGKey(0)
    state_dim, hidden = 32, 100
    kx1, kx2, kx3, kp = jax.random.split(key, 4)
    w1, b1, w2, b2 = init_params(kp, state_dim, hidden)

    # Hoisted one-time weight prep (f32 and bf16-MXU variants).
    params_f32 = prepare_mlp_rotation_value_params(w1, b1, w2, b2)
    params_bf16 = prepare_mlp_rotation_value_params(w1, b1, w2, b2,
                                                    mxu_dtype=jnp.bfloat16)

    def ref_fwd(x):
        # Pure-JAX reference: same math as the PyTorch forward (tanh is unused).
        return jnp.maximum(x @ w1.T + b1, 0.0) @ w2.T + b2

    # Small batch: single grid step, single in-kernel chunk, partial x block.
    x_small = jax.random.normal(kx1, (8, state_dim), jnp.float32)
    out_small = jax.block_until_ready(mlp_rotation_value_prepared(x_small, params_f32))
    assert out_small.shape == (8, 1)
    assert jnp.allclose(out_small, ref_fwd(x_small), atol=1e-4, rtol=1e-4), \
        "f32 mismatch (small batch)"

    # Non-multiple batch: exercises the un-padded partial tail + chunk loop.
    x_mid = jax.random.normal(kx2, (300, state_dim), jnp.float32)
    out_mid = jax.block_until_ready(mlp_rotation_value_prepared(x_mid, params_f32))
    assert out_mid.shape == (300, 1)
    assert jnp.allclose(out_mid, ref_fwd(x_mid), atol=1e-4, rtol=1e-4), \
        "f32 mismatch (mid batch)"

    # Larger batch: exercises the nb>=2 megacore split, multi-chunk tiles and
    # a partial final grid block; also runs the in-kernel bf16-MXU path.
    x_big = jax.random.normal(kx3, (1200, state_dim), jnp.float32)
    out_big = jax.block_until_ready(mlp_rotation_value_prepared(x_big, params_f32))
    assert out_big.shape == (1200, 1)
    assert jnp.allclose(out_big, ref_fwd(x_big), atol=1e-4, rtol=1e-4), \
        "f32 mismatch (large batch)"

    out_bf16 = jax.block_until_ready(mlp_rotation_value_prepared(x_big, params_bf16))
    assert jnp.allclose(out_bf16, ref_fwd(x_big), atol=5e-2, rtol=5e-2), \
        "bf16 mismatch (large batch)"

    print("KERNEL_OK")
</pallas_src>

<mosaic_0001>
module attributes {stable_mosaic.version = 11 : i64} {
  func.func @mlp_kernel(%arg0: i32, %arg1: memref<128x32xf32, #tpu.memory_space<vmem>>, %arg2: memref<128x32xf32, #tpu.memory_space<vmem>>, %arg3: memref<128x1xf32, #tpu.memory_space<vmem>>, %arg4: memref<128x1xf32, #tpu.memory_space<vmem>>, %arg5: memref<1xf32, #tpu.memory_space<smem>>, %arg6: memref<1x128xf32, #tpu.memory_space<vmem>>) attributes {dimension_semantics = [#tpu.dimension_semantics<parallel>], iteration_bounds = array<i64: 1>, scalar_prefetch = 0 : i64, scratch_operands = 0 : i64, tpu.core_type = #tpu.core_type<tc>, window_params = [{transform_indices = @transform_0, window_bounds = array<i64: 128, 32>}, {pipeline_mode = #tpu.pipeline_mode<synchronous>, transform_indices = @transform_1, window_bounds = array<i64: 128, 32>}, {pipeline_mode = #tpu.pipeline_mode<synchronous>, transform_indices = @transform_2, window_bounds = array<i64: 128, 1>}, {pipeline_mode = #tpu.pipeline_mode<synchronous>, transform_indices = @transform_3, window_bounds = array<i64: 128, 1>}, {transform_indices = @transform_4, window_bounds = array<i64: 1>}, {transform_indices = @transform_5, window_bounds = array<i64: 1, 128>}]} {
    %c0 = arith.constant 0 : index
    %c0_0 = arith.constant 0 : index
    %0 = vector.load %arg2[%c0, %c0_0] : memref<128x32xf32, #tpu.memory_space<vmem>>, vector<128x32xf32>
    %c0_1 = arith.constant 0 : index
    %c0_2 = arith.constant 0 : index
    %1 = vector.load %arg3[%c0_1, %c0_2] : memref<128x1xf32, #tpu.memory_space<vmem>>, vector<128x1xf32>
    %c0_3 = arith.constant 0 : index
    %c0_4 = arith.constant 0 : index
    %2 = vector.load %arg4[%c0_3, %c0_4] : memref<128x1xf32, #tpu.memory_space<vmem>>, vector<128x1xf32>
    %c0_5 = arith.constant 0 : index
    %3 = memref.load %arg5[%c0_5] : memref<1xf32, #tpu.memory_space<smem>>
    %c0_6 = arith.constant 0 : index
    %c0_7 = arith.constant 0 : index
    %4 = vector.load %arg1[%c0_6, %c0_7] : memref<128x32xf32, #tpu.memory_space<vmem>>, vector<128x32xf32>
    %cst = arith.constant dense<0.000000e+00> : vector<128x128xf32>
    %5 = tpu.matmul %0, %4, %cst {dimension_numbers = #tpu.dot_dimension_numbers<[1], [1], [0], [0], [0, 0, 1, 0], [], []>} : vector<128x32xf32>, vector<128x32xf32>, vector<128x128xf32> -> vector<128x128xf32>
    %6 = vector.broadcast %1 : vector<128x1xf32> to vector<128x128xf32>
    %7 = arith.addf %5, %6 : vector<128x128xf32>
    %cst_8 = arith.constant 0.000000e+00 : f32
    %8 = vector.broadcast %cst_8 : f32 to vector<128x128xf32>
    %9 = arith.maximumf %7, %8 : vector<128x128xf32>
    %10 = vector.broadcast %2 : vector<128x1xf32> to vector<128x128xf32>
    %11 = arith.mulf %9, %10 : vector<128x128xf32>
    %cst_9 = arith.constant dense<0.000000e+00> : vector<128xf32>
    %12 = vector.multi_reduction <add>, %11, %cst_9 [0] : vector<128x128xf32> to vector<128xf32>
    %13 = vector.shape_cast %12 : vector<128xf32> to vector<1x128xf32>
    %14 = vector.broadcast %3 : f32 to vector<1x128xf32>
    %15 = arith.addf %13, %14 : vector<1x128xf32>
    %c0_10 = arith.constant 0 : index
    %c0_11 = arith.constant 0 : index
    %16 = vector.load %arg6[%c0_10, %c0_11] : memref<1x128xf32, #tpu.memory_space<vmem>>, vector<1x128xf32>
    tpu.vector_store %arg6[%c0_10, %c0_11], %15 {strides = array<i32>} : memref<1x128xf32, #tpu.memory_space<vmem>>, vector<1x128xf32>,
    return
  }
  func.func @transform_0(%arg0: i32) -> (i32, i32) {
    %c0_i32 = arith.constant 0 : i32
    %c0_i32_0 = arith.constant 0 : i32
    return %arg0, %c0_i32 : i32, i32
  }
  func.func @transform_1(%arg0: i32) -> (i32, i32) {
    %c0_i32 = arith.constant 0 : i32
    %c0_i32_0 = arith.constant 0 : i32
    %c0_i32_1 = arith.constant 0 : i32
    return %c0_i32, %c0_i32_0 : i32, i32
  }
  func.func @transform_2(%arg0: i32) -> (i32, i32) {
    %c0_i32 = arith.constant 0 : i32
    %c0_i32_0 = arith.constant 0 : i32
    %c0_i32_1 = arith.constant 0 : i32
    return %c0_i32, %c0_i32_0 : i32, i32
  }
  func.func @transform_3(%arg0: i32) -> (i32, i32) {
    %c0_i32 = arith.constant 0 : i32
    %c0_i32_0 = arith.constant 0 : i32
    %c0_i32_1 = arith.constant 0 : i32
    return %c0_i32, %c0_i32_0 : i32, i32
  }
  func.func @transform_4(%arg0: i32) -> i32 {
    %c0_i32 = arith.constant 0 : i32
    %c0_i32_0 = arith.constant 0 : i32
    return %c0_i32 : i32
  }
  func.func @transform_5(%arg0: i32) -> (i32, i32) {
    %c0_i32 = arith.constant 0 : i32
    %c0_i32_0 = arith.constant 0 : i32
    return %c0_i32, %arg0 : i32, i32
  }
}

</mosaic_0001>

<bundles_post_ra>
// kernel: tpu_custom_call.1
= control target key start
LH: loop header
LB: loop body
LE: loop exit
PB: predicated region body
PF: predicated region fallthrough
CT: control target
= control target key end

     0   :  { %vm167_vm0 = vcmask 261120   ;;  %v592_v1 = vmov 0   ;;  %s917_s0 = inlined_call_operand.vmem [shape: f32[8,32], index: 0, kind: input, shape index: {}]   ;;  %s918_s1 = inlined_call_operand.vmem [shape: f32[128,32], index: 1, kind: input, shape index: {}]   ;;  %s919_s2 = inlined_call_operand.vmem [shape: f32[128,1], index: 2, kind: input, shape index: {}]   ;;  %s920_s3 = inlined_call_operand.vmem [shape: f32[128,1], index: 3, kind: input, shape index: {}]   ;;  %s921_s4 = inlined_call_operand.<no memory space> [shape: f32[1], index: 4, kind: input, shape index: {}]   ;;  %s922_s5 = inlined_call_operand.hbm [shape: f32[1,128], index: 5, kind: output, shape index: {}]  }
   0x1   :  { %v86_v0 = vld [vmem:[%s917_s0 + $0x78] sm:$0xff]  ;;  %564 = vset.pattern.permute.xlu1 %v592_v1  ;;  %563 = vset.pattern.permute.xlu0 %v592_v1  ;;  %v40_v2 = vld [vmem:[%s919_s2 + $0x10] sm:$0xff]  ;;  %v38_v3 = vld [vmem:[%s919_s2] sm:$0xff] }
   0x2   :  { %481 = vmatpush.xpose.msk.msra.mxu0 %vm167_vm0, %v86_v0  ;;  %513 = vmatpush.xpose.msk.msra.mxu1 %vm167_vm0, %v86_v0  ;;  %v42_v4 = vld [vmem:[%s919_s2 + $0x20] sm:$0xff]  ;;  %v85_v5 = vld [vmem:[%s917_s0 + $0x70] sm:$0xff]  ;;  %v84_v6 = vld [vmem:[%s917_s0 + $0x68] sm:$0xff] }
   0x3   :  { %514 = vmatpush.xpose.msk.msra.mxu2 %vm167_vm0, %v86_v0  ;;  %515 = vmatpush.xpose.msk.msra.mxu3 %vm167_vm0, %v86_v0 }
   0x4   :  { %565 = vset.pattern.permute.xlu2 %v592_v1  ;;  %99 = vperm.xlu1 %564, %v40_v2  }
   0x5   :  { %89 = vperm.xlu0 %563, %v38_v3   ;;  %109 = vperm.xlu2 %565, %v42_v4  }
   0x6   :  { %482 = vmatpush.xpose.msk.msra.mxu0 %vm167_vm0, %v85_v5  ;;  %516 = vmatpush.xpose.msk.msra.mxu1 %vm167_vm0, %v85_v5 }
   0x7   :  { %517 = vmatpush.xpose.msk.msra.mxu2 %vm167_vm0, %v85_v5  ;;  %518 = vmatpush.xpose.msk.msra.mxu3 %vm167_vm0, %v85_v5 }
   0x8   :  { %11 = vsyncpa [#allocation4], 0  ;;  %v41_v7 = vld [vmem:[%s919_s2 + $0x18] sm:$0xff]  ;;  %v39_v8 = vld [vmem:[%s919_s2 + $0x8] sm:$0xff]  ;;  %s593_s16 = smov [#allocation3]   ;;  %s472_s20 = sshll.u32 %s922_s5, 4  ;;  %s473_s20 = int_to_ptr.hbm [resolvable:$true] %s472_s20 }
   0x9   :  { %v43_v9 = vld [vmem:[%s919_s2 + $0x28] sm:$0xff]  ;;  %v83_v10 = vld [vmem:[%s917_s0 + $0x60] sm:$0xff]  ;;  %v82_v11 = vld [vmem:[%s917_s0 + $0x58] sm:$0xff]  ;;  %s470_s17 = sshll.u32 %s593_s16, 4  ;;  %s471_s17 = int_to_ptr.vmem [resolvable:$true] %s470_s17 }
   0xa   :  { %483 = vmatpush.xpose.msk.msra.mxu0 %vm167_vm0, %v84_v6  ;;  %519 = vmatpush.xpose.msk.msra.mxu1 %vm167_vm0, %v84_v6  ;;  %v45_v12 = vld [vmem:[%s919_s2 + $0x38] sm:$0xff]  ;;  %v44_v13 = vld [vmem:[%s919_s2 + $0x30] sm:$0xff]  ;;  %v46_v14 = vld [vmem:[%s919_s2 + $0x40] sm:$0xff] }
   0xb   :  { %520 = vmatpush.xpose.msk.msra.mxu2 %vm167_vm0, %v84_v6  ;;  %521 = vmatpush.xpose.msk.msra.mxu3 %vm167_vm0, %v84_v6  ;;  %v81_v15 = vld [vmem:[%s917_s0 + $0x50] sm:$0xff]  ;;  %v80_v16 = vld [vmem:[%s917_s0 + $0x48] sm:$0xff]  ;;  %v49_v19 = vld [vmem:[%s919_s2 + $0x58] sm:$0xff] }
   0xc   :  { %104 = vperm.xlu1 %564, %v41_v7   ;;  %v48_v17 = vld [vmem:[%s919_s2 + $0x50] sm:$0xff]  ;;  %v47_v18 = vld [vmem:[%s919_s2 + $0x48] sm:$0xff]  ;;  %v79_v20 = vld [vmem:[%s917_s0 + $0x40] sm:$0xff] }
   0xd   :  { %94 = vperm.xlu0 %563, %v39_v8   ;;  %114 = vperm.xlu2 %565, %v43_v9   ;;  %v78_v21 = vld [vmem:[%s917_s0 + $0x38] sm:$0xff]  ;;  %v51_v22 = vld [vmem:[%s919_s2 + $0x68] sm:$0xff]  ;;  %v50_v23 = vld [vmem:[%s919_s2 + $0x60] sm:$0xff] }
   0xe   :  { %484 = vmatpush.xpose.msk.msra.mxu0 %vm167_vm0, %v83_v10  ;;  %522 = vmatpush.xpose.msk.msra.mxu1 %vm167_vm0, %v83_v10  ;;  %v52_v24 = vld [vmem:[%s919_s2 + $0x70] sm:$0xff]  ;;  %v76_v26 = vld [vmem:[%s917_s0 + $0x28] sm:$0xff]  ;;  %v54_v27 = vld [vmem:[%s920_s3] sm:$0xff] }
   0xf   :  { %523 = vmatpush.xpose.msk.msra.mxu2 %vm167_vm0, %v83_v10  ;;  %524 = vmatpush.xpose.msk.msra.mxu3 %vm167_vm0, %v83_v10  ;;  %v77_v25 = vld [vmem:[%s917_s0 + $0x30] sm:$0xff]  ;;  %v53_v28 = vld [vmem:[%s919_s2 + $0x78] sm:$0xff]  ;;  %v55_v29 = vld [vmem:[%s920_s3 + $0x8] sm:$0xff] }
  0x10   :  { %v75_v30 = vld [vmem:[%s917_s0 + $0x20] sm:$0xff]  ;;  %v74_v31 = vld [vmem:[%s917_s0 + $0x18] sm:$0xff]  ;;  %v56_v33 = vld [vmem:[%s920_s3 + $0x10] sm:$0xff] }
  0x11   :  { %v57_v32 = vld [vmem:[%s920_s3 + $0x18] sm:$0xff]  ;;  %v58_v34 = vld [vmem:[%s920_s3 + $0x20] sm:$0xff]  ;;  %v73_v35 = vld [vmem:[%s917_s0 + $0x10] sm:$0xff] }
  0x12   :  { %485 = vmatpush.xpose.msk.msra.mxu0 %vm167_vm0, %v82_v11  ;;  %525 = vmatpush.xpose.msk.msra.mxu1 %vm167_vm0, %v82_v11  ;;  %v72_v36 = vld [vmem:[%s917_s0 + $0x8] sm:$0xff]  ;;  %v60_v37 = vld [vmem:[%s920_s3 + $0x30] sm:$0xff]  ;;  %v61_v39 = vld [vmem:[%s920_s3 + $0x38] sm:$0xff] }
  0x13   :  { %526 = vmatpush.xpose.msk.msra.mxu2 %vm167_vm0, %v82_v11  ;;  %527 = vmatpush.xpose.msk.msra.mxu3 %vm167_vm0, %v82_v11  ;;  %v59_v38 = vld [vmem:[%s920_s3 + $0x28] sm:$0xff]  ;;  %v71_v40 = vld [vmem:[%s917_s0] sm:$0xff]  ;;  %v64_v47 = vld [vmem:[%s920_s3 + $0x50] sm:$0xff] }
  0x14   :  { %124 = vperm.xlu1 %564, %v45_v12   ;;  %v22_v41 = vld [vmem:[%s918_s1] sm:$0xff]  ;;  %v63_v45 = vld [vmem:[%s920_s3 + $0x48] sm:$0xff]  ;;  %v65_v53 = vld [vmem:[%s920_s3 + $0x58] sm:$0xff] }
  0x15   :  { %119 = vperm.xlu0 %563, %v44_v13   ;;  %129 = vperm.xlu2 %565, %v46_v14   ;;  %v26_v42 = vld [vmem:[%s918_s1 + $0x20] sm:$0xff]  ;;  %v23_v48 = vld [vmem:[%s918_s1 + $0x8] sm:$0xff]  ;;  %v24_v55 = vld [vmem:[%s918_s1 + $0x10] sm:$0xff] }
  0x16   :  { %486 = vmatpush.xpose.msk.msra.mxu0 %vm167_vm0, %v81_v15  ;;  %528 = vmatpush.xpose.msk.msra.mxu1 %vm167_vm0, %v81_v15  ;;  %v30_v43 = vld [vmem:[%s918_s1 + $0x40] sm:$0xff]  ;;  %v27_v49 = vld [vmem:[%s918_s1 + $0x28] sm:$0xff]  ;;  %v28_v56 = vld [vmem:[%s918_s1 + $0x30] sm:$0xff] }
  0x17   :  { %529 = vmatpush.xpose.msk.msra.mxu2 %vm167_vm0, %v81_v15  ;;  %530 = vmatpush.xpose.msk.msra.mxu3 %vm167_vm0, %v81_v15  ;;  %v34_v44 = vld [vmem:[%s918_s1 + $0x60] sm:$0xff]  ;;  %v31_v50 = vld [vmem:[%s918_s1 + $0x48] sm:$0xff]  ;;  %v32_v57 = vld [vmem:[%s918_s1 + $0x50] sm:$0xff] }
  0x18   :  { %v62_v46 = vld [vmem:[%s920_s3 + $0x40] sm:$0xff]  ;;  %v35_v51 = vld [vmem:[%s918_s1 + $0x68] sm:$0xff]  ;;  %v36_v58 = vld [vmem:[%s918_s1 + $0x70] sm:$0xff] }
  0x19   :  { %v66_v52 = vld [vmem:[%s920_s3 + $0x60] sm:$0xff]  ;;  %v67_v54 = vld [vmem:[%s920_s3 + $0x68] sm:$0xff]  ;;  %v69_v59 = vld [vmem:[%s920_s3 + $0x78] sm:$0xff] }
  0x1a   :  { %487 = vmatpush.xpose.msk.msra.mxu0 %vm167_vm0, %v80_v16  ;;  %531 = vmatpush.xpose.msk.msra.mxu1 %vm167_vm0, %v80_v16  ;;  %v68_v60 = vld [vmem:[%s920_s3 + $0x70] sm:$0xff]  ;;  %v25_v61 = vld [vmem:[%s918_s1 + $0x18] sm:$0xff] }
  0x1b   :  { %532 = vmatpush.xpose.msk.msra.mxu2 %vm167_vm0, %v80_v16  ;;  %533 = vmatpush.xpose.msk.msra.mxu3 %vm167_vm0, %v80_v16  ;;  %v29_v62 = vld [vmem:[%s918_s1 + $0x38] sm:$0xff] }
  0x1c   :  { %139 = vperm.xlu1 %564, %v48_v17   ;;  %v33_v63 = vld [vmem:[%s918_s1 + $0x58] sm:$0xff] }
  0x1d   :  { %134 = vperm.xlu0 %563, %v47_v18   ;;  %144 = vperm.xlu2 %565, %v49_v19   ;;  %v37_v0 = vld [vmem:[%s918_s1 + $0x78] sm:$0xff] }
  0x1e   :  { %488 = vmatpush.xpose.msk.msra.mxu0 %vm167_vm0, %v79_v20  ;;  %534 = vmatpush.xpose.msk.msra.mxu1 %vm167_vm0, %v79_v20 }
  0x1f   :  { %535 = vmatpush.xpose.msk.msra.mxu2 %vm167_vm0, %v79_v20  ;;  %536 = vmatpush.xpose.msk.msra.mxu3 %vm167_vm0, %v79_v20 }
  0x22   :  { %489 = vmatpush.xpose.msk.msra.mxu0 %vm167_vm0, %v78_v21  ;;  %537 = vmatpush.xpose.msk.msra.mxu1 %vm167_vm0, %v78_v21 }
  0x23   :  { %538 = vmatpush.xpose.msk.msra.mxu2 %vm167_vm0, %v78_v21  ;;  %539 = vmatpush.xpose.msk.msra.mxu3 %vm167_vm0, %v78_v21 }
  0x24   :  { %154 = vperm.xlu1 %564, %v51_v22  }
  0x25   :  { %149 = vperm.xlu0 %563, %v50_v23   ;;  %159 = vperm.xlu2 %565, %v52_v24  }
  0x26   :  { %490 = vmatpush.xpose.msk.msra.mxu0 %vm167_vm0, %v77_v25  ;;  %540 = vmatpush.xpose.msk.msra.mxu1 %vm167_vm0, %v77_v25 }
  0x27   :  { %541 = vmatpush.xpose.msk.msra.mxu2 %vm167_vm0, %v77_v25  ;;  %542 = vmatpush.xpose.msk.msra.mxu3 %vm167_vm0, %v77_v25 }
  0x2a   :  { %491 = vmatpush.xpose.msk.msra.mxu0 %vm167_vm0, %v76_v26  ;;  %543 = vmatpush.xpose.msk.msra.mxu1 %vm167_vm0, %v76_v26 }
  0x2b   :  { %544 = vmatpush.xpose.msk.msra.mxu2 %vm167_vm0, %v76_v26  ;;  %545 = vmatpush.xpose.msk.msra.mxu3 %vm167_vm0, %v76_v26 }
  0x2c   :  { %347 = vperm.xlu1 %564, %v54_v27  }
  0x2d   :  { %164 = vperm.xlu0 %563, %v53_v28   ;;  %352 = vperm.xlu2 %565, %v55_v29  }
  0x2e   :  { %492 = vmatpush.xpose.msk.msra.mxu0 %vm167_vm0, %v75_v30  ;;  %546 = vmatpush.xpose.msk.msra.mxu1 %vm167_vm0, %v75_v30 }
  0x2f   :  { %547 = vmatpush.xpose.msk.msra.mxu2 %vm167_vm0, %v75_v30  ;;  %548 = vmatpush.xpose.msk.msra.mxu3 %vm167_vm0, %v75_v30 }
  0x32   :  { %493 = vmatpush.xpose.msk.msra.mxu0 %vm167_vm0, %v74_v31  ;;  %549 = vmatpush.xpose.msk.msra.mxu1 %vm167_vm0, %v74_v31 }
  0x33   :  { %550 = vmatpush.xpose.msk.msra.mxu2 %vm167_vm0, %v74_v31  ;;  %551 = vmatpush.xpose.msk.msra.mxu3 %vm167_vm0, %v74_v31 }
  0x34   :  { %362 = vperm.xlu1 %564, %v57_v32  }
  0x35   :  { %357 = vperm.xlu0 %563, %v56_v33   ;;  %367 = vperm.xlu2 %565, %v58_v34  }
  0x36   :  { %494 = vmatpush.xpose.msk.msra.mxu0 %vm167_vm0, %v73_v35  ;;  %552 = vmatpush.xpose.msk.msra.mxu1 %vm167_vm0, %v73_v35 }
  0x37   :  { %553 = vmatpush.xpose.msk.msra.mxu2 %vm167_vm0, %v73_v35  ;;  %554 = vmatpush.xpose.msk.msra.mxu3 %vm167_vm0, %v73_v35 }
  0x3a   :  { %495 = vmatpush.xpose.msk.msra.mxu0 %vm167_vm0, %v72_v36  ;;  %555 = vmatpush.xpose.msk.msra.mxu1 %vm167_vm0, %v72_v36 }
  0x3b   :  { %556 = vmatpush.xpose.msk.msra.mxu2 %vm167_vm0, %v72_v36  ;;  %557 = vmatpush.xpose.msk.msra.mxu3 %vm167_vm0, %v72_v36 }
  0x3c   :  { %377 = vperm.xlu1 %564, %v60_v37  }
  0x3d   :  { %372 = vperm.xlu0 %563, %v59_v38   ;;  %382 = vperm.xlu2 %565, %v61_v39  }
  0x3e   :  { %496 = vmatpush.xpose.msk.msra.mxu0 %vm167_vm0, %v71_v40  ;;  %558 = vmatpush.xpose.msk.msra.mxu1 %vm167_vm0, %v71_v40 }
  0x3f   :  { %559 = vmatpush.xpose.msk.msra.mxu2 %vm167_vm0, %v71_v40  ;;  %560 = vmatpush.xpose.msk.msra.mxu3 %vm167_vm0, %v71_v40 }
  0x41   :  { %497 = vmatmul.msk.f32.vlgmr.msra.gmra.mxu0 %vm167_vm0, %v22_v41  ;;  %501 = vmatmul.msk.f32.vlgmr.msra.gmra.mxu1 %vm167_vm0, %v26_v42 }
  0x42   :  { %505 = vmatmul.msk.f32.vlgmr.msra.gmra.mxu2 %vm167_vm0, %v30_v43  ;;  %509 = vmatmul.msk.f32.vlgmr.msra.gmra.mxu3 %vm167_vm0, %v34_v44 }
  0x44   :  { %392 = vperm.xlu1 %564, %v63_v45  }
  0x45   :  { %387 = vperm.xlu0 %563, %v62_v46   ;;  %397 = vperm.xlu2 %565, %v64_v47  }
  0x49   :  { %498 = vmatmul.msk.f32.gmra.mxu0 %vm167_vm0, %v23_v48  ;;  %502 = vmatmul.msk.f32.gmra.mxu1 %vm167_vm0, %v27_v49 }
  0x4a   :  { %506 = vmatmul.msk.f32.gmra.mxu2 %vm167_vm0, %v31_v50  ;;  %510 = vmatmul.msk.f32.gmra.mxu3 %vm167_vm0, %v35_v51 }
  0x4c   :  { %407 = vperm.xlu1 %564, %v66_v52  }
  0x4d   :  { %402 = vperm.xlu0 %563, %v65_v53   ;;  %412 = vperm.xlu2 %565, %v67_v54  }
  0x51   :  { %499 = vmatmul.msk.f32.gmra.mxu0 %vm167_vm0, %v24_v55  ;;  %503 = vmatmul.msk.f32.gmra.mxu1 %vm167_vm0, %v28_v56 }
  0x52   :  { %507 = vmatmul.msk.f32.gmra.mxu2 %vm167_vm0, %v32_v57  ;;  %511 = vmatmul.msk.f32.gmra.mxu3 %vm167_vm0, %v36_v58 }
  0x54   :  { %422 = vperm.xlu1 %564, %v69_v59  }
  0x55   :  { %417 = vperm.xlu0 %563, %v68_v60  }
  0x59   :  { %500 = vmatmul.msk.f32.gmra.mxu0 %vm167_vm0, %v25_v61  ;;  %504 = vmatmul.msk.f32.gmra.mxu1 %vm167_vm0, %v29_v62 }
  0x5a   :  { %508 = vmatmul.msk.f32.gmra.mxu2 %vm167_vm0, %v33_v63  ;;  %512 = vmatmul.msk.f32.gmra.mxu3 %vm167_vm0, %v37_v0 }
  0x5f   :  { %v110_v3 = vpop.permute.xlu2 %109 }
  0x67   :  { %v115_v6 = vpop.permute.xlu2 %114 }
  0x6f   :  { %v130_v9 = vpop.permute.xlu2 %129 }
  0x76   :  { %v100_v2 = vpop.permute.xlu1 %99 }
  0x77   :  { %v90_v1 = vpop.permute.xlu0 %89  ;;  %v896_v12 = vpop.permute.xlu2 %144 }
  0x7e   :  { %v105_v5 = vpop.permute.xlu1 %104 }
  0x7f   :  { %v95_v4 = vpop.permute.xlu0 %94  ;;  %v902_v15 = vpop.permute.xlu2 %159 }
  0x86   :  { %v125_v8 = vpop.permute.xlu1 %124 }
  0x87   :  { %v120_v7 = vpop.permute.xlu0 %119  ;;  %v353_v21 = vpop.permute.xlu2 %352 }
  0x8e   :  { %v140_v11 = vpop.permute.xlu1 %139 }
  0x8f   :  { %v135_v10 = vpop.permute.xlu0 %134  ;;  %v368_v33 = vpop.permute.xlu2 %367 }
  0x96   :  { %v900_v14 = vpop.permute.xlu1 %154 }
  0x97   :  { %v898_v13 = vpop.permute.xlu0 %149  ;;  %v383_v53 = vpop.permute.xlu2 %382 }
  0x9e   :  { %v348_v19 = vpop.permute.xlu1 %347 }
  0x9f   :  { %v904_v16 = vpop.permute.xlu0 %164 }
  0xa6   :  { %v363_v25 = vpop.permute.xlu1 %362 }
  0xa7   :  { %v358_v24 = vpop.permute.xlu0 %357 }
  0xae   :  { %v378_v38 = vpop.permute.xlu1 %377 }
  0xaf   :  { %v373_v35 = vpop.permute.xlu0 %372 }
  0xb6   :  { %v393_v63 = vpop.permute.xlu1 %392 }
  0xb7   :  { %v388_v58 = vpop.permute.xlu0 %387 }
  0xbe   :  { %v281_v17 = vpop.f32.mrf.mxu0  ;;  %v293_v18 = vpop.f32.mrf.mxu1 }
  0xbf   :  { %v282_v30 = vadd.f32 %v281_v17, %v90_v1  ;;  %v294_v40 = vadd.f32 %v293_v18, %v110_v3 }
  0xc1   :  { %v329_v36 = vmax.f32 %v282_v30, 0.0  ;;  %v333_v49 = vmax.f32 %v294_v40, 0.0 }
  0xc3   :  { %v425_v44 = vmul.f32 %v348_v19, %v329_v36  ;;  %v429_v59 = vmul.f32 %v368_v33, %v333_v49 }
  0xc5   :  { %v305_v20 = vpop.f32.mrf.mxu2  ;;  %v317_v26 = vpop.f32.mrf.mxu3 }
  0xc6   :  { %v284_v22 = vpop.f32.mrf.mxu0  ;;  %v296_v23 = vpop.f32.mrf.mxu1  ;;  %v306_v60 = vadd.f32 %v305_v20, %v130_v9  ;;  %v318_v20 = vadd.f32 %v317_v26, %v898_v13 }
  0xc7   :  { %v285_v27 = vadd.f32 %v284_v22, %v95_v4  ;;  %v297_v45 = vadd.f32 %v296_v23, %v115_v6  ;;  %v398_v23 = vpop.permute.xlu2 %397 }
  0xc8   :  { %v337_v6 = vmax.f32 %v306_v60, 0.0 }
  0xc9   :  { %v330_v34 = vmax.f32 %v285_v27, 0.0  ;;  %v334_v54 = vmax.f32 %v297_v45, 0.0  ;;  %v403_v27 = vpop.permute.xlu0 %402 }
  0xca   :  { %v433_v9 = vmul.f32 %v388_v58, %v337_v6 }
  0xcb   :  { %v426_v41 = vmul.f32 %v353_v21, %v330_v34  ;;  %v430_v1 = vmul.f32 %v373_v35, %v334_v54 }
  0xcd   :  { %v308_v28 = vpop.f32.mrf.mxu2  ;;  %v320_v39 = vpop.f32.mrf.mxu3  ;;  %v441_v50 = vadd.f32 %v426_v41, %v425_v44 }
  0xce   :  { %v287_v29 = vpop.f32.mrf.mxu0  ;;  %v299_v32 = vpop.f32.mrf.mxu1 }
  0xcf   :  { %v288_v31 = vadd.f32 %v287_v29, %v100_v2  ;;  %v300_v51 = vadd.f32 %v299_v32, %v120_v7  ;;  %v309_v2 = vadd.f32 %v308_v28, %v135_v10  ;;  %v321_v28 = vadd.f32 %v320_v39, %v900_v14  ;;  %v413_v41 = vpop.permute.xlu2 %412 }
  0xd0   :  { %v341_v32 = vmax.f32 %v318_v20, 0.0 }
  0xd1   :  { %v331_v37 = vmax.f32 %v288_v31, 0.0  ;;  %v335_v61 = vmax.f32 %v300_v51, 0.0  ;;  %v338_v19 = vmax.f32 %v309_v2, 0.0  ;;  %v408_v31 = vpop.permute.xlu1 %407 }
  0xd2   :  { %v437_v26 = vmul.f32 %v408_v31, %v341_v32 }
  0xd3   :  { %v427_v46 = vmul.f32 %v358_v24, %v331_v37  ;;  %v431_v7 = vmul.f32 %v378_v38, %v335_v61  ;;  %v434_v10 = vmul.f32 %v393_v63, %v338_v19 }
  0xd5   :  { %v311_v42 = vpop.f32.mrf.mxu2  ;;  %v442_v55 = vadd.f32 %v441_v50, %v427_v46  ;;  %v323_v0 = vpop.f32.mrf.mxu3 }
  0xd6   :  { %v290_v43 = vpop.f32.mrf.mxu0  ;;  %v302_v48 = vpop.f32.mrf.mxu1  ;;  %v312_v17 = vadd.f32 %v311_v42, %v140_v11  ;;  %v324_v34 = vadd.f32 %v323_v0, %v902_v15 }
  0xd7   :  { %v291_v47 = vadd.f32 %v290_v43, %v105_v5  ;;  %v303_v57 = vadd.f32 %v302_v48, %v125_v8  ;;  %v418_v43 = vpop.permute.xlu0 %417 }
  0xd8   :  { %v339_v24 = vmax.f32 %v312_v17, 0.0  ;;  %v343_v38 = vmax.f32 %v324_v34, 0.0 }
  0xd9   :  { %v332_v52 = vmax.f32 %v291_v47, 0.0  ;;  %v336_v4 = vmax.f32 %v303_v57, 0.0  ;;  %v423_v46 = vpop.permute.xlu1 %422 }
  0xda   :  { %v435_v33 = vmul.f32 %v398_v23, %v339_v24  ;;  %v439_v44 = vmul.f32 %v418_v43, %v343_v38 }
  0xdb   :  { %v428_v56 = vmul.f32 %v363_v25, %v332_v52  ;;  %v432_v21 = vmul.f32 %v383_v53, %v336_v4 }
  0xdd   :  { %v443_v62 = vadd.f32 %v442_v55, %v428_v56  ;;  %v314_v5 = vpop.f32.mrf.mxu2  ;;  %v326_v11 = vpop.f32.mrf.mxu3 }
  0xde   :  { %v315_v8 = vadd.f32 %v314_v5, %v896_v12  ;;  %v342_v12 = vmax.f32 %v321_v28, 0.0  ;;  %v327_v13 = vadd.f32 %v326_v11, %v904_v16  ;;  %v462_v16 = vstv %s921_s4 }
  0xdf   :  { %v444_v3 = vadd.f32 %v443_v62, %v429_v59 }
  0xe0   :  { %v340_v30 = vmax.f32 %v315_v8, 0.0  ;;  %v438_v42 = vmul.f32 %v413_v41, %v342_v12  ;;  %v344_v39 = vmax.f32 %v327_v13, 0.0 }
  0xe1   :  { %v445_v18 = vadd.f32 %v444_v3, %v430_v1 }
  0xe2   :  { %v436_v36 = vmul.f32 %v403_v27, %v340_v30  ;;  %v440_v47 = vmul.f32 %v423_v46, %v344_v39 }
  0xe3   :  { %v446_v22 = vadd.f32 %v445_v18, %v431_v7 }
  0xe5   :  { %v447_v25 = vadd.f32 %v446_v22, %v432_v21 }
  0xe7   :  { %v448_v29 = vadd.f32 %v447_v25, %v433_v9 }
  0xe9   :  { %v449_v35 = vadd.f32 %v448_v29, %v434_v10 }
  0xeb   :  { %v450_v37 = vadd.f32 %v449_v35, %v435_v33 }
  0xed   :  { %v451_v40 = vadd.f32 %v450_v37, %v436_v36 }
  0xef   :  { %v452_v14 = vadd.f32 %v451_v40, %v437_v26 }
  0xf1   :  { %v453_v45 = vadd.f32 %v452_v14, %v438_v42 }
  0xf3   :  { %v454_v48 = vadd.f32 %v453_v45, %v439_v44 }
  0xf5   :  { %v455_v15 = vadd.f32 %v454_v48, %v440_v47 }
  0xf7   :  { %v456_v49 = vrot.slane %v455_v15, 4 }
  0xf9   :  { %v457_v50 = vadd.f32 %v456_v49, %v455_v15 }
  0xfb   :  { %v458_v51 = vrot.slane %v457_v50, 2 }
  0xfd   :  { %v459_v52 = vadd.f32 %v458_v51, %v457_v50 }
  0xff   :  { %v460_v53 = vrot.slane %v459_v52, 1 }
 0x101   :  { %v461_v54 = vadd.f32 %v460_v53, %v459_v52 }
 0x103   :  { %v463_v55 = vadd.f32 %v462_v16, %v461_v54 }
 0x105   :  { %464 = vst [vmem:[#allocation3] sm:$0x1] %v463_v55 }
 0x106   :  { %475 = dma.vmem_to_hbm [thread:$0]  %s471_s17, 16, %s473_s20, [#allocation4]  }
 0x107   :  { %590 = dma.done.wait [#allocation4], 16  }
 0x108   :  { %591 = vsyncadd [#allocation4], 4294967280 }
 0x109   :  { %480 = vsyncpa [#allocation4], 1 }

</bundles_post_ra>
